<compile_context>
chip_gen: v7x
topology: tpu7x:2x2x1
jax: 0.10.0
libtpu: 0.0.40
codegen_flags: <defaults>
</compile_context>

<pallas_src>
import numpy as np
import jax
import jax.numpy as jnp
from jax.experimental import pallas as pl
from jax.experimental.pallas import tpu as pltpu


# ----------------------------- configuration -----------------------------
class Cfg:
    seq_len = 16
    down_sampling_window = 2
    down_sampling_layers = 2          # scales: 16 -> 8 -> 4
    var_num = 4                       # channels of x_enc
    time_feat = 4                     # features of x_mark_enc


CFG = Cfg()

_VMEM = pl.BlockSpec(memory_space=pltpu.MemorySpace.VMEM)


# --------------------------- pooling matrices ----------------------------
def _make_pool_mats(T, w, layers):
    """P_i: (T, T // w**i) with 1/w**i over each non-overlapping block.

    Applying AvgPool1d(w) i times (the torch cascade) is exactly x @ P_i,
    including the floor-division output lengths, because
    floor(floor(T/w)/w) == floor(T/w**2) and the averaged blocks coincide.
    Built once at param-prep time so the kernel only does matmuls.
    """
    mats = []
    for i in range(1, layers + 1):
        win = w ** i
        t_out = T // win
        p = np.zeros((T, t_out), np.float32)
        for t in range(t_out):
            p[t * win:(t + 1) * win, t] = 1.0 / win
        mats.append(jnp.asarray(p))
    return mats


# ------------------------------ Pallas kernel ------------------------------
def _down_pool_kernel(*refs):
    """One launch for the whole pyramid: out_i = x @ P_i (MXU), time on lanes."""
    L = CFG.down_sampling_layers
    x_ref = refs[0]
    p_refs = refs[1:1 + L]
    out_refs = refs[1 + L:]
    x = x_ref[...]                                      # (B*N, T) fp32
    for p_ref, o_ref in zip(p_refs, out_refs):
        o_ref[...] = jnp.dot(x, p_ref[...],
                             preferred_element_type=jnp.float32)


# ------------------------------ module forward ------------------------------
def down_sample(x_enc, x_mark_enc, pool_mats):
    """Replicates Down_sample.forward: returns (x_enc list, x_mark_enc list)."""
    cfg = CFG
    B, T, N = x_enc.shape
    w = cfg.down_sampling_window
    L = cfg.down_sampling_layers

    # (B, T, N) -> (B, N, T) -> (B*N, T): time on the TPU lane axis
    # (this is the same permute(0, 2, 1) the torch module performs).
    xt = jnp.transpose(x_enc, (0, 2, 1)).reshape(B * N, T)

    out_lens = [T // w ** (i + 1) for i in range(L)]
    out_shapes = tuple(jax.ShapeDtypeStruct((B * N, t), jnp.float32)
                       for t in out_lens)

    pooled = pl.pallas_call(
        _down_pool_kernel,
        out_shape=out_shapes,
        in_specs=[_VMEM] * (1 + L),
        out_specs=tuple([_VMEM] * L),
    )(xt, *pool_mats)
    if not isinstance(pooled, (tuple, list)):
        pooled = (pooled,)

    # x_enc pyramid (first entry is the original tensor, as in the reference)
    x_list = [x_enc]
    for ti, y in zip(out_lens, pooled):
        x_list.append(jnp.transpose(y.reshape(B, N, ti), (0, 2, 1)))

    # x_mark pyramid: pure strided slicing, no arithmetic -> plain JAX.
    xm_list = [x_mark_enc]
    cur = x_mark_enc
    for _ in range(L):
        cur = cur[:, ::w, :]
        xm_list.append(cur)

    return x_list, xm_list


# ----------------------- pure-JAX reference (torch semantics) -----------------------
def _ref_down_sample(x_enc, x_mark_enc, w, L):
    x_list = [x_enc]
    xm_list = [x_mark_enc]
    cur = jnp.transpose(x_enc, (0, 2, 1))               # (B, N, T)
    cur_m = x_mark_enc
    for _ in range(L):
        B, N, T = cur.shape
        cur = cur[:, :, :(T // w) * w].reshape(B, N, T // w, w).mean(-1)
        x_list.append(jnp.transpose(cur, (0, 2, 1)))
        cur_m = cur_m[:, ::w, :]
        xm_list.append(cur_m)
    return x_list, xm_list


# TODO(synk): x_mark_enc down-sampling and the identity pass-through of the
# first pyramid entries are pure indexing/bookkeeping with no compute, so they
# remain plain-JAX glue rather than Pallas kernels.

if __name__ == "__main__":
    key = jax.random.PRNGKey(0)
    kx, km = jax.random.split(key)
    B = 2
    x_enc = jax.random.normal(kx, (B, CFG.seq_len, CFG.var_num), jnp.float32)
    x_mark_enc = jax.random.normal(km, (B, CFG.seq_len, CFG.time_feat), jnp.float32)

    pool_mats = _make_pool_mats(CFG.seq_len, CFG.down_sampling_window,
                                CFG.down_sampling_layers)

    fwd = jax.jit(lambda x, xm: down_sample(x, xm, pool_mats))
    x_list, xm_list = fwd(x_enc, x_mark_enc)
    x_list = [jax.block_until_ready(x) for x in x_list]
    xm_list = [jax.block_until_ready(x) for x in xm_list]

    # shape checks (match the torch module's output pyramid)
    w = CFG.down_sampling_window
    for i, x in enumerate(x_list):
        assert x.shape == (B, CFG.seq_len // w ** i, CFG.var_num), x.shape
    for i, xm in enumerate(xm_list):
        assert xm.shape == (B, CFG.seq_len // w ** i, CFG.time_feat), xm.shape

    # value check against a pure-JAX port of the torch forward
    rx, rm = _ref_down_sample(x_enc, x_mark_enc, w, CFG.down_sampling_layers)
    for a, b in zip(x_list, rx):
        np.testing.assert_allclose(np.asarray(a), np.asarray(b),
                                   rtol=1e-5, atol=1e-5)
    for a, b in zip(xm_list, rm):
        np.testing.assert_allclose(np.asarray(a), np.asarray(b),
                                   rtol=1e-6, atol=1e-6)
    assert all(bool(jnp.all(jnp.isfinite(x))) for x in x_list)

    print("KERNEL_OK")
</pallas_src>

<mosaic_0001>
module attributes {stable_mosaic.version = 11 : i64} {
  func.func @_down_pool_kernel(%arg0: memref<8x16xf32, #tpu.memory_space<vmem>>, %arg1: memref<16x8xf32, #tpu.memory_space<vmem>>, %arg2: memref<16x4xf32, #tpu.memory_space<vmem>>, %arg3: memref<8x8xf32, #tpu.memory_space<vmem>>, %arg4: memref<8x4xf32, #tpu.memory_space<vmem>>) attributes {dimension_semantics = [], scalar_prefetch = 0 : i64, scratch_operands = 0 : i64, tpu.core_type = #tpu.core_type<tc>} {
    %c0 = arith.constant 0 : index
    %c0_0 = arith.constant 0 : index
    %0 = vector.load %arg0[%c0, %c0_0] : memref<8x16xf32, #tpu.memory_space<vmem>>, vector<8x16xf32>
    %c0_1 = arith.constant 0 : index
    %c0_2 = arith.constant 0 : index
    %1 = vector.load %arg1[%c0_1, %c0_2] : memref<16x8xf32, #tpu.memory_space<vmem>>, vector<16x8xf32>
    %cst = arith.constant dense<0.000000e+00> : vector<8x8xf32>
    %2 = tpu.matmul %0, %1, %cst {dimension_numbers = #tpu.dot_dimension_numbers<[1], [0], [0], [1], [0, 0, 1, 1], [], []>} : vector<8x16xf32>, vector<16x8xf32>, vector<8x8xf32> -> vector<8x8xf32>
    %c0_3 = arith.constant 0 : index
    %c0_4 = arith.constant 0 : index
    %3 = vector.load %arg3[%c0_3, %c0_4] : memref<8x8xf32, #tpu.memory_space<vmem>>, vector<8x8xf32>
    tpu.vector_store %arg3[%c0_3, %c0_4], %2 {strides = array<i32>} : memref<8x8xf32, #tpu.memory_space<vmem>>, vector<8x8xf32>,
    %c0_5 = arith.constant 0 : index
    %c0_6 = arith.constant 0 : index
    %4 = vector.load %arg2[%c0_5, %c0_6] : memref<16x4xf32, #tpu.memory_space<vmem>>, vector<16x4xf32>
    %cst_7 = arith.constant dense<0.000000e+00> : vector<8x4xf32>
    %5 = tpu.matmul %0, %4, %cst_7 {dimension_numbers = #tpu.dot_dimension_numbers<[1], [0], [0], [1], [0, 0, 1, 1], [], []>} : vector<8x16xf32>, vector<16x4xf32>, vector<8x4xf32> -> vector<8x4xf32>
    %c0_8 = arith.constant 0 : index
    %c0_9 = arith.constant 0 : index
    %6 = vector.load %arg4[%c0_8, %c0_9] : memref<8x4xf32, #tpu.memory_space<vmem>>, vector<8x4xf32>
    tpu.vector_store %arg4[%c0_8, %c0_9], %5 {strides = array<i32>} : memref<8x4xf32, #tpu.memory_space<vmem>>, vector<8x4xf32>,
    return
  }
}

</mosaic_0001>

<bundles_post_ra>
// kernel: _lambda_.1
= control target key start
LH: loop header
LB: loop body
LE: loop exit
PB: predicated region body
PF: predicated region fallthrough
CT: control target
= control target key end

     0   :  { %10 = vsyncpa [#allocation3], 0  ;;  %s451_s0 = inlined_call_operand.hbm [shape: f32[8,16], index: 0, kind: input, shape index: {}]   ;;  %s452_s1 = inlined_call_operand.hbm [shape: f32[16,8], index: 1, kind: input, shape index: {}]   ;;  %s453_s2 = inlined_call_operand.hbm [shape: f32[16,4], index: 2, kind: input, shape index: {}]   ;;  %s454_s3 = inlined_call_operand.hbm [shape: f32[8,8], index: 3, kind: output, shape index: {0}]   ;;  %s455_s4 = inlined_call_operand.vmem [shape: f32[8,4], index: 4, kind: output, shape index: {1}]  }
   0x1   :  { %11 = vsyncpa [#allocation6], 0 }
   0x2   :  { %12 = vsyncpa [#allocation4], 0  ;;  %s360_s15 = smov [#allocation5]   ;;  %s266_s19 = scalar_lea.hbm %s452_s1, 256 }
   0x3   :  { %s28_s16 = sshll.u32 %s360_s15, 4  ;;  %p267_p0 = scmp.ne.s32.totalorder %s452_s1, %s266_s19  ;;  %s29_s16 = int_to_ptr.vmem [resolvable:$true] %s28_s16 }
   0x4   :  { %p270_p1 = scmp.lt.u32.totalorder %s266_s19, %s452_s1 }
   0x6   :  { %p272_p2 = pnand %p270_p1, %p267_p0 }
   0x8   :  { %275 = shalt.err (!%p272_p2)
}
   0x9   :  { %s276_s24 = scalar_lea.vmem %s29_s16, 256  ;;  %p281_p4 = scmp.lt.s32.totalorder %s29_s16, %s29_s16 }
   0xa   :  { %p277_p3 = scmp.ne.s32.totalorder %s29_s16, %s276_s24  ;;  %p282_p5 = scmp.lt.s32.totalorder %s276_s24, %s276_s24 }
   0xc   :  { %p283_p6 = por %p282_p5, %p281_p4 }
   0xe   :  { %p284_p7 = pnand %p283_p6, %p277_p3 }
  0x10   :  { %287 = shalt.err (!%p284_p7)
}
  0x11   :  { %s361_s25 = smov 128   ;;  %s362_s26 = smov 8  }
  0x12   :  { %34 = dma.hbm_to_vmem [thread:$0]  %s452_s1, 256, %s29_s16, [#allocation6], %s361_s25, %s361_s25, %s362_s26  }
  0x13   :  { %s363_s29 = smov [#allocation2]   ;;  %s364_s5 = smov [#allocation7]  }
  0x14   :  { %s19_s30 = sshll.u32 %s363_s29, 4  ;;  %s40_s6 = sshll.u32 %s364_s5, 4  ;;  %s20_s30 = int_to_ptr.vmem [resolvable:$true] %s19_s30  ;;  %s41_s6 = int_to_ptr.vmem [resolvable:$true] %s40_s6 }
  0x15   :  { %s288_s9 = scalar_lea.hbm %s451_s0, 128 }
  0x16   :  { %p289_p8 = scmp.ne.s32.totalorder %s451_s0, %s288_s9  ;;  %p292_p9 = scmp.lt.u32.totalorder %s288_s9, %s451_s0 }
  0x18   :  { %p294_p10 = pnand %p292_p9, %p289_p8 }
  0x1a   :  { %297 = shalt.err (!%p294_p10)
}
  0x1b   :  { %s298_s1 = scalar_lea.vmem %s20_s30, 128  ;;  %p303_p12 = scmp.lt.s32.totalorder %s20_s30, %s20_s30 }
  0x1c   :  { %p299_p11 = scmp.ne.s32.totalorder %s20_s30, %s298_s1  ;;  %p304_p13 = scmp.lt.s32.totalorder %s298_s1, %s298_s1 }
  0x1e   :  { %p305_p0 = por %p304_p13, %p303_p12 }
  0x20   :  { %p306_p1 = pnand %p305_p0, %p299_p11 }
  0x22   :  { %309 = shalt.err (!%p306_p1)
}
  0x23   :  { %22 = dma.hbm_to_vmem [thread:$0]  %s451_s0, 128, %s20_s30, [#allocation3]  }
  0x24   :  { %s310_s18 = scalar_lea.hbm %s453_s2, 256 }
  0x25   :  { %p311_p2 = scmp.ne.s32.totalorder %s453_s2, %s310_s18  ;;  %p314_p3 = scmp.lt.u32.totalorder %s310_s18, %s453_s2 }
  0x27   :  { %p316_p4 = pnand %p314_p3, %p311_p2 }
  0x29   :  { %319 = shalt.err (!%p316_p4)
}
  0x2a   :  { %s320_s23 = scalar_lea.vmem %s41_s6, 256  ;;  %p325_p6 = scmp.lt.s32.totalorder %s41_s6, %s41_s6 }
  0x2b   :  { %p321_p5 = scmp.ne.s32.totalorder %s41_s6, %s320_s23  ;;  %p326_p7 = scmp.lt.s32.totalorder %s320_s23, %s320_s23 }
  0x2d   :  { %p327_p8 = por %p326_p7, %p325_p6 }
  0x2f   :  { %p328_p9 = pnand %p327_p8, %p321_p5 }
  0x31   :  { %331 = shalt.err (!%p328_p9)
}
  0x32   :  { %46 = dma.hbm_to_vmem [thread:$0]  %s453_s2, 256, %s41_s6, [#allocation6], %s361_s25, %s361_s25, %s362_s26  }
  0x33   :  { %354 = dma.done.wait [#allocation3], 128  }
  0x34   :  { %355 = vsyncadd [#allocation3], 4294967168 }
  0x35   :  { %356 = dma.done.wait [#allocation6], 512  }
  0x36   :  { %357 = vsyncadd [#allocation6], 4294966784  ;;  %v365_v0 = vmov 0.0|0.0   ;;  %vm366_vm0 = vmmov 0   ;;  %v367_v1 = vmov 0.0   ;;  %v57_v2 = vld [vmem:[#allocation5] sm:$0xff] }
  0x37   :  { %251 = vmatprep.subr.bf16.mxu0 %v365_v0  ;;  %254 = vmatprep.subr.bf16.mxu1 %v365_v0  ;;  %v58_v3 = vld [vmem:[#allocation5 + $0x8] sm:$0xff]  ;;  %v135_v4 = vld [vmem:[#allocation7] sm:$0xff]  ;;  %v136_v6 = vld [vmem:[#allocation7 + $0x8] sm:$0xff]  ;;  %vm59_vm1 = vcmask 130048   ;;  %s368_s2 = smov [#allocation8]   ;;  %vm133_vm2 = vcmask 64512  }
  0x38   :  { %241 = vmatprep.mubr.msk.f32.mxu0 %vm366_vm0, %v367_v1  ;;  %248 = vmatprep.mubr.msk.f32.mxu1 %vm366_vm0, %v367_v1  ;;  %v252_v5 = vpack.c.bf16 %v58_v3, %v57_v2  ;;  %v255_v7 = vpack.c.bf16 %v136_v6, %v135_v4  ;;  %v56_v8 = vld [vmem:[#allocation2] sm:$0xff]  ;;  %s215_s25 = sshll.u32 %s368_s2, 4  ;;  %vm207_vm3 = vcmask 31744   ;;  %s216_s25 = int_to_ptr.vmem [resolvable:$true] %s215_s25 }
  0x39   :  { %s332_s28 = scalar_lea.vmem %s216_s25, 128  ;;  %p337_p11 = scmp.lt.s32.totalorder %s216_s25, %s216_s25 }
  0x3a   :  { %253 = vmatpush3.bf16.msra.mxu0 %v252_v5  ;;  %256 = vmatpush3.bf16.msra.mxu1 %v255_v7  ;;  %p333_p10 = scmp.ne.s32.totalorder %s216_s25, %s332_s28  ;;  %p338_p12 = scmp.lt.s32.totalorder %s332_s28, %s332_s28 }
  0x3c   :  { %p339_p13 = por %p338_p12, %p337_p11 }
  0x3d   :  { %242 = vmatmul.mubr.msk.f32.vlgmr.msra.gmra.mrb[0].mxu0 %vm59_vm1, %v56_v8  ;;  %249 = vmatmul.mubr.msk.f32.vlgmr.msra.gmra.mrb[0].mxu1 %vm59_vm1, %v56_v8 }
  0x3e   :  { %p340_p0 = pnand %p339_p13, %p333_p10 }
 0x110   :  { %v129_v9 = vpop.f32.mrb[0].mxu0  ;;  %v203_v10 = vpop.f32.mrb[0].mxu1 }
 0x111   :  { %v243_v11 = vpop.f32.mrb[1].mxu0  ;;  %134 = vst.msk [vmem:[#allocation8] sm:$0xff] %vm133_vm2, %v129_v9  ;;  %v250_v12 = vpop.f32.mrb[1].mxu1 }
 0x112   :  { %208 = vst.msk [vmem:[%s455_s4] sm:$0xff] %vm207_vm3, %v203_v10 }
 0x113   :  { %343 = shalt.err (!%p340_p0)
}
 0x114   :  { %s344_s5 = scalar_lea.hbm %s454_s3, 128 }
 0x115   :  { %p345_p1 = scmp.ne.s32.totalorder %s454_s3, %s344_s5  ;;  %p348_p2 = scmp.lt.u32.totalorder %s344_s5, %s454_s3 }
 0x117   :  { %p350_p3 = pnand %p348_p2, %p345_p1 }
 0x119   :  { %353 = shalt.err (!%p350_p3)
}
 0x11a   :  { %218 = dma.vmem_to_hbm [thread:$0]  %s216_s25, 128, %s454_s3, [#allocation4]  }
 0x11b   :  { %358 = dma.done.wait [#allocation4], 128  }
 0x11c   :  { %359 = vsyncadd [#allocation4], 4294967168 }
 0x11d   :  { %226 = vsyncpa [#allocation3], 1 }
 0x11e   :  { %227 = vsyncpa [#allocation6], 1 }
 0x11f   :  { %228 = vsyncpa [#allocation4], 1 }

</bundles_post_ra>
